<compile_context>
chip_gen: v6e
topology: v6e:2x2x1
jax: 0.10.0
libtpu: 0.0.40
codegen_flags: <defaults>
</compile_context>

<pallas_src>
import jax
import jax.numpy as jnp
from jax.experimental import pallas as pl
from jax.experimental.pallas import tpu as pltpu


def _ratios_kernel(xi_ref, xj_ref, o_ref):
    # xi_ref / xj_ref / o_ref: (TE, P*D) lane-dense tiles in VMEM.
    o_ref[...] = xi_ref[...] - xj_ref[...]


def relative_measure_map_weights(particles, weights, edges, *,
                                 edge_tile=1024,
                                 vmem_budget_bytes=24 * 1024 * 1024):
    """particles: (num_nodes, P, D), weights: (R, P), edges: (E, 2) int.

    Returns (ratios (E, P, D), RM_weights (E, P)) — same as the torch forward.
    """
    num_nodes, P, D = particles.shape
    E = int(edges.shape[0])
    dtype = particles.dtype
    PD = P * D
    itemsize = jnp.dtype(dtype).itemsize

    # --- RM_weights: pure broadcast of weights[0]; no edge dependence, so it
    #     never touches the kernel. ---
    RM_weights = jnp.broadcast_to(weights[0], (E, P))

    # --- pick an edge tile: multiple of 8 sublanes, clamped so
    #     3 arrays x 2 pipeline buffers x TE x PD fits the VMEM budget. ---
    max_te = max(8, vmem_budget_bytes // (3 * 2 * PD * itemsize))
    te = min(edge_tile, max(E, 8), max_te)
    te = max(8, (te // 8) * 8)
    E_pad = pl.cdiv(E, te) * te

    # --- gather xi / xj onto a lane-dense (E_pad, P*D) layout in the wrapper;
    #     pad the *indices*, not the gathered slabs. ---
    table = particles.reshape(num_nodes, PD)
    i_idx = jnp.pad(edges[:, 0].astype(jnp.int32), (0, E_pad - E))
    j_idx = jnp.pad(edges[:, 1].astype(jnp.int32), (0, E_pad - E))
    xi = jnp.take(table, i_idx, axis=0)   # (E_pad, P*D)
    xj = jnp.take(table, j_idx, axis=0)   # (E_pad, P*D)

    spec = pl.BlockSpec((te, PD), lambda t: (t, 0))

    ratios_flat = pl.pallas_call(
        _ratios_kernel,
        grid=(E_pad // te,),
        in_specs=[spec, spec],
        out_specs=spec,
        out_shape=jax.ShapeDtypeStruct((E_pad, PD), dtype),
        # Reuse xi's HBM slab for the output (identical block index maps, each
        # output block written exactly once) -> one fewer E_pad*P*D buffer.
        input_output_aliases={0: 0},
        compiler_params=pltpu.CompilerParams(
            dimension_semantics=("parallel",)),
        cost_estimate=pl.CostEstimate(
            flops=E_pad * PD,
            transcendentals=0,
            bytes_accessed=3 * E_pad * PD * itemsize),
    )(xi, xj)

    # Contiguous (free) reshape back to the PyTorch convention; no transpose.
    ratios = ratios_flat[:E].reshape(E, P, D)
    return ratios, RM_weights


def _reference(particles, weights, edges):
    xi = particles[edges[:, 0]]
    xj = particles[edges[:, 1]]
    ratios = xi - xj
    RM_weights = jnp.tile(weights[0:1, :], (edges.shape[0], 1))
    return ratios, RM_weights


if __name__ == "__main__":
    key = jax.random.PRNGKey(0)
    num_nodes, P, D, E = 6, 64, 4, 10   # small, forward-consistent shapes

    k1, k2, k3 = jax.random.split(key, 3)
    particles = jax.random.normal(k1, (num_nodes, P, D), dtype=jnp.float32)
    weights = jax.nn.softmax(
        jax.random.normal(k2, (num_nodes, P), dtype=jnp.float32), axis=-1)
    edges = jax.random.randint(k3, (E, 2), 0, num_nodes, dtype=jnp.int32)

    fwd = jax.jit(relative_measure_map_weights)
    ratios, rm_weights = fwd(particles, weights, edges)
    ratios = jax.block_until_ready(ratios)
    rm_weights = jax.block_until_ready(rm_weights)

    ref_ratios, ref_w = _reference(particles, weights, edges)
    assert ratios.shape == (E, P, D) and rm_weights.shape == (E, P)
    assert jnp.allclose(ratios, ref_ratios, atol=1e-6, rtol=1e-6)
    assert jnp.allclose(rm_weights, ref_w, atol=1e-6, rtol=1e-6)

    print("KERNEL_OK")
</pallas_src>

<mosaic_0001>
module attributes {stable_mosaic.version = 11 : i64} {
  func.func @_ratios_kernel(%arg0: i32, %arg1: memref<8x256xf32, #tpu.memory_space<vmem>>, %arg2: memref<8x256xf32, #tpu.memory_space<vmem>>, %arg3: memref<8x256xf32, #tpu.memory_space<vmem>>) attributes {dimension_semantics = [#tpu.dimension_semantics<parallel>], iteration_bounds = array<i64: 2>, scalar_prefetch = 0 : i64, scratch_operands = 0 : i64, tpu.core_type = #tpu.core_type<tc>, window_params = [{transform_indices = @transform_0, window_bounds = array<i64: 8, 256>}, {transform_indices = @transform_1, window_bounds = array<i64: 8, 256>}, {transform_indices = @transform_2, window_bounds = array<i64: 8, 256>}]} {
    %c0 = arith.constant 0 : index
    %c0_0 = arith.constant 0 : index
    %0 = vector.load %arg1[%c0, %c0_0] : memref<8x256xf32, #tpu.memory_space<vmem>>, vector<8x256xf32>
    %c0_1 = arith.constant 0 : index
    %c0_2 = arith.constant 0 : index
    %1 = vector.load %arg2[%c0_1, %c0_2] : memref<8x256xf32, #tpu.memory_space<vmem>>, vector<8x256xf32>
    %2 = arith.subf %0, %1 : vector<8x256xf32>
    %c0_3 = arith.constant 0 : index
    %c0_4 = arith.constant 0 : index
    %3 = vector.load %arg3[%c0_3, %c0_4] : memref<8x256xf32, #tpu.memory_space<vmem>>, vector<8x256xf32>
    tpu.vector_store %arg3[%c0_3, %c0_4], %2 {strides = array<i32>} : memref<8x256xf32, #tpu.memory_space<vmem>>, vector<8x256xf32>,
    return
  }
  func.func @transform_0(%arg0: i32) -> (i32, i32) {
    %c0_i32 = arith.constant 0 : i32
    %c0_i32_0 = arith.constant 0 : i32
    return %arg0, %c0_i32 : i32, i32
  }
  func.func @transform_1(%arg0: i32) -> (i32, i32) {
    %c0_i32 = arith.constant 0 : i32
    %c0_i32_0 = arith.constant 0 : i32
    return %arg0, %c0_i32 : i32, i32
  }
  func.func @transform_2(%arg0: i32) -> (i32, i32) {
    %c0_i32 = arith.constant 0 : i32
    %c0_i32_0 = arith.constant 0 : i32
    return %arg0, %c0_i32 : i32, i32
  }
}

</mosaic_0001>

<bundles_post_ra>
// kernel: relative_measure_map_weights.1
= control target key start
LH: loop header
LB: loop body
LE: loop exit
PB: predicated region body
PF: predicated region fallthrough
CT: control target
= control target key end

     0   :  { %s267_s9 = smov 0   ;;  %s295_s0 = inlined_call_operand.vmem [shape: f32[16,256], index: 0, kind: input, shape index: {}, may-alias: {0,2}]   ;;  %s296_s1 = inlined_call_operand.vmem [shape: f32[16,256], index: 1, kind: input, shape index: {}]   ;;  %s297_s2 = inlined_call_operand.vmem [shape: f32[16,256], index: 2, kind: output, shape index: {}, may-alias: {0,2}]  }
   0x1 LB: > { %s239_s10 = sadd.s32 4294967295, %s269_s9   ;;  %p243_p0 = scmp.ge.s32.totalorder %s269_s9, 1  ;;  %s269_s9 = sphi %s267_s9, %s12_s9  }
   0x2   : > { %p122_p1 = scmp.lt.s32.totalorder %s269_s9, 3 }
   0x4   : > { %p123_p2 = pnand %p243_p0, %p122_p1 }
   0x5   : > { %p149_p3 = scmp.lt.s32.totalorder (!%p123_p2), %s239_s10, 1 }
   0x6   : > { %126 = sbr.rel (%p123_p2) target bundleno = 19 (0x13), region = 28 }
   0xb   : > { %s299_s10 = smov (!%p149_p3, %s239_s10), 1 }
   0xc   : > { %s252_s11 = sshll.u32 %s299_s10, 4 }
   0xd   : > { %s153_s14 = scalar_lea.vmem %s295_s0, %s252_s11  ;;  %s158_s17 = scalar_lea.vmem %s296_s1, %s252_s11 }
   0xe   : > { %s163_s20 = scalar_lea.vmem %s297_s2, %s252_s11  ;;  %v164_v0 = vld [vmem:[%s153_s14] sm:$0xff]  ;;  %v165_v1 = vld [vmem:[%s153_s14 + $0x8] sm:$0xff] }
   0xf   : > { %v166_v2 = vld [vmem:[%s158_s17] sm:$0xff]  ;;  %v167_v3 = vld [vmem:[%s158_s17 + $0x8] sm:$0xff] }
  0x10   : > { %v168_v4 = vsub.f32 %v164_v0, %v166_v2  ;;  %v169_v5 = vsub.f32 %v165_v1, %v167_v3 }
  0x12   : > { %170 = vst [vmem:[%s163_s20] sm:$0xff] %v168_v4  ;;  %171 = vst [vmem:[%s163_s20 + $0x8] sm:$0xff] %v169_v5 }
  0x13 PF: > { %s12_s9 = sadd.s32 1, %s269_s9  }
  0x14   : > { %p9_p4 = scmp.ge.s32.totalorder %s12_s9, 4  }
  0x16   :  { %11 = sbr.rel (!%p9_p4) target bundleno = 1 (0x1), region = 61 }

</bundles_post_ra>
